<compile_context>
chip_gen: v5e
topology: v5e:2x2
jax: 0.10.0
libtpu: 0.0.40
codegen_flags: <defaults>
</compile_context>

<pallas_src>
import functools

import jax
import jax.numpy as jnp
from jax.experimental import pallas as pl
from jax.experimental.pallas import tpu as pltpu


def _layernorm_kernel(z_ref, g_ref, b_ref, o_ref, *, eps: float, inv_cm1: float):
    # z_ref: (BN, C, T) block; g_ref/b_ref: (1, C, 1)
    z = z_ref[...].astype(jnp.float32)

    # mean over the channel axis (dim=1 of the original NCHW tensor)
    mu = jnp.mean(z, axis=1, keepdims=True)           # (BN, 1, T)
    d = z - mu                                        # (BN, C, T)

    # torch.std default: unbiased (Bessel correction, divide by C-1)
    var = jnp.sum(d * d, axis=1, keepdims=True) * inv_cm1   # (BN, 1, T)
    denom = jnp.sqrt(var) + eps                       # (x - mu) / (std + eps)

    # Hoisted divide: EUP approximate reciprocal on the (BN, 1, T) row,
    # one Newton-Raphson step restores ~f32 precision. Cheap vs C*T divides.
    inv = pl.reciprocal(denom, approx=True)
    inv = inv * (2.0 - denom * inv)

    out = d * inv * g_ref[...] + b_ref[...]
    o_ref[...] = out.astype(o_ref.dtype)


def layer_normalization(z, a2, b2, eps: float = 1e-5):
    """z: (N, C, H, W); a2, b2: (1, C, 1, 1). Returns (N, C, H, W)."""
    n, c, h, w = z.shape
    hw = h * w
    z2 = z.reshape(n, c, hw)
    gamma = a2.reshape(1, c, 1).astype(jnp.float32)
    beta = b2.reshape(1, c, 1).astype(jnp.float32)

    LANE = 128
    TILE_BUDGET = 2 * 1024 * 1024  # ~2 MiB f32 input per block
    ITEM = 4                       # compute in f32

    per_elem_bytes = c * hw * ITEM

    if per_elem_bytes <= TILE_BUDGET:
        # Whole (C, HW) plane per batch element fits -> no HW tiling, no
        # padding (block last dim equals the full array dim, so the (8,128)
        # divisibility rule does not apply).  Pack batch elements per block.
        t_hw = hw
        hw_work = hw
        bn = 1
        for cand in range(n, 0, -1):
            if n % cand == 0 and cand * per_elem_bytes <= TILE_BUDGET:
                bn = cand
                break
    else:
        # Must tile the spatial axis: lane-aligned tiles.  Prefer a tile size
        # that divides ceil(hw/128)*128 so padding is at most 127 columns.
        bn = 1
        hw_128 = -(-hw // LANE) * LANE
        k = hw_128 // LANE
        max_k = max(1, TILE_BUDGET // (ITEM * c * LANE))
        best = 1
        for d in range(min(k, max_k), 0, -1):
            if k % d == 0:
                best = d
                break
        if 2 * best >= max_k:
            t_hw = best * LANE                 # divides hw_128: pad < 128 cols
            hw_work = hw_128
        else:
            t_hw = max_k * LANE                # divisors too small; larger pad
            hw_work = -(-hw // t_hw) * t_hw
        if hw_work != hw:
            z2 = jnp.pad(z2, ((0, 0), (0, 0), (0, hw_work - hw)))

    grid = (n // bn, hw_work // t_hw)

    out = pl.pallas_call(
        functools.partial(
            _layernorm_kernel, eps=float(eps), inv_cm1=1.0 / max(c - 1, 1)
        ),
        out_shape=jax.ShapeDtypeStruct((n, c, hw_work), z.dtype),
        grid=grid,
        in_specs=[
            pl.BlockSpec((bn, c, t_hw), lambda i, j: (i, 0, j)),  # z tile
            pl.BlockSpec((1, c, 1), lambda i, j: (0, 0, 0)),      # gamma
            pl.BlockSpec((1, c, 1), lambda i, j: (0, 0, 0)),      # beta
        ],
        out_specs=pl.BlockSpec((bn, c, t_hw), lambda i, j: (i, 0, j)),
        compiler_params=pltpu.CompilerParams(
            dimension_semantics=("parallel", "parallel"),
            vmem_limit_bytes=48 * 1024 * 1024,
        ),
    )(z2, gamma, beta)

    if hw_work != hw:
        out = out[:, :, :hw]
    return out.reshape(n, c, h, w)


def _reference(x, a2, b2, eps):
    mu = jnp.mean(x, axis=1, keepdims=True)
    sigma = jnp.std(x, axis=1, keepdims=True, ddof=1)  # unbiased, like torch.std
    return (x - mu) / (sigma + eps) * a2 + b2


if __name__ == "__main__":
    key = jax.random.PRNGKey(0)
    N, C, H, W = 2, 4, 16, 16
    x = jax.random.normal(key, (N, C, H, W), dtype=jnp.float32)

    # Deterministic params matching nn.Parameter(torch.ones/zeros(...)).
    a2 = jnp.ones((1, C, 1, 1), dtype=jnp.float32)
    b2 = jnp.zeros((1, C, 1, 1), dtype=jnp.float32)

    y = layer_normalization(x, a2, b2, eps=1e-5)
    jax.block_until_ready(y)
    ref = _reference(x, a2, b2, 1e-5)
    assert jnp.allclose(y, ref, atol=2e-5, rtol=2e-5), "mismatch vs reference"

    # Non-128-multiple spatial size (full-dim block path, no padding copies).
    x2 = jax.random.normal(jax.random.PRNGKey(1), (N, C, 10, 10), dtype=jnp.float32)
    y2 = layer_normalization(x2, a2, b2, eps=1e-5)
    jax.block_until_ready(y2)
    ref2 = _reference(x2, a2, b2, 1e-5)
    assert jnp.allclose(y2, ref2, atol=2e-5, rtol=2e-5), "mismatch (small-HW path)"

    # Large spatial size: exercises the HW-tiled path (grid over lane tiles).
    x3 = jax.random.normal(jax.random.PRNGKey(2), (1, C, 384, 384), dtype=jnp.float32)
    y3 = layer_normalization(x3, a2, b2, eps=1e-5)
    jax.block_until_ready(y3)
    ref3 = _reference(x3, a2, b2, 1e-5)
    assert jnp.allclose(y3, ref3, atol=2e-5, rtol=2e-5), "mismatch (tiled path)"

    print("KERNEL_OK")
</pallas_src>

<mosaic_0001>
module attributes {stable_mosaic.version = 11 : i64} {
  func.func @_layernorm_kernel(%arg0: i32, %arg1: i32, %arg2: memref<2x4x256xf32, #tpu.memory_space<vmem>>, %arg3: memref<1x4x1xf32, #tpu.memory_space<vmem>>, %arg4: memref<1x4x1xf32, #tpu.memory_space<vmem>>, %arg5: memref<2x4x256xf32, #tpu.memory_space<vmem>>) attributes {dimension_semantics = [#tpu.dimension_semantics<parallel>, #tpu.dimension_semantics<parallel>], iteration_bounds = array<i64: 1, 1>, scalar_prefetch = 0 : i64, scratch_operands = 0 : i64, tpu.core_type = #tpu.core_type<tc>, window_params = [{transform_indices = @transform_0, window_bounds = array<i64: 2, 4, 256>}, {pipeline_mode = #tpu.pipeline_mode<synchronous>, transform_indices = @transform_1, window_bounds = array<i64: 1, 4, 1>}, {pipeline_mode = #tpu.pipeline_mode<synchronous>, transform_indices = @transform_2, window_bounds = array<i64: 1, 4, 1>}, {transform_indices = @transform_3, window_bounds = array<i64: 2, 4, 256>}]} {
    %c0 = arith.constant 0 : index
    %c0_0 = arith.constant 0 : index
    %c0_1 = arith.constant 0 : index
    %0 = vector.load %arg2[%c0, %c0_0, %c0_1] : memref<2x4x256xf32, #tpu.memory_space<vmem>>, vector<2x4x256xf32>
    %cst = arith.constant dense<0.000000e+00> : vector<2x256xf32>
    %1 = vector.multi_reduction <add>, %0, %cst [1] : vector<2x4x256xf32> to vector<2x256xf32>
    %2 = vector.shape_cast %1 : vector<2x256xf32> to vector<2x1x256xf32>
    %cst_2 = arith.constant 4.000000e+00 : f32
    %3 = vector.broadcast %cst_2 : f32 to vector<2x1x256xf32>
    %4 = arith.divf %2, %3 : vector<2x1x256xf32>
    %5 = vector.broadcast %4 : vector<2x1x256xf32> to vector<2x4x256xf32>
    %6 = arith.subf %0, %5 : vector<2x4x256xf32>
    %7 = arith.mulf %6, %6 : vector<2x4x256xf32>
    %cst_3 = arith.constant dense<0.000000e+00> : vector<2x256xf32>
    %8 = vector.multi_reduction <add>, %7, %cst_3 [1] : vector<2x4x256xf32> to vector<2x256xf32>
    %9 = vector.shape_cast %8 : vector<2x256xf32> to vector<2x1x256xf32>
    %cst_4 = arith.constant 0.333333343 : f32
    %10 = vector.broadcast %cst_4 : f32 to vector<2x1x256xf32>
    %11 = arith.mulf %9, %10 : vector<2x1x256xf32>
    %12 = math.sqrt %11 : vector<2x1x256xf32>
    %cst_5 = arith.constant 9.99999974E-6 : f32
    %13 = vector.broadcast %cst_5 : f32 to vector<2x1x256xf32>
    %14 = arith.addf %12, %13 : vector<2x1x256xf32>
    %15 = tpu.reciprocal %14 {approx = true} : vector<2x1x256xf32> -> vector<2x1x256xf32>
    %16 = arith.mulf %14, %15 : vector<2x1x256xf32>
    %cst_6 = arith.constant 2.000000e+00 : f32
    %17 = vector.broadcast %cst_6 : f32 to vector<2x1x256xf32>
    %18 = arith.subf %17, %16 : vector<2x1x256xf32>
    %19 = arith.mulf %15, %18 : vector<2x1x256xf32>
    %20 = vector.broadcast %19 : vector<2x1x256xf32> to vector<2x4x256xf32>
    %21 = arith.mulf %6, %20 : vector<2x4x256xf32>
    %c0_7 = arith.constant 0 : index
    %c0_8 = arith.constant 0 : index
    %c0_9 = arith.constant 0 : index
    %22 = vector.load %arg3[%c0_7, %c0_8, %c0_9] : memref<1x4x1xf32, #tpu.memory_space<vmem>>, vector<1x4x1xf32>
    %23 = vector.broadcast %22 : vector<1x4x1xf32> to vector<2x4x256xf32>
    %24 = arith.mulf %21, %23 : vector<2x4x256xf32>
    %c0_10 = arith.constant 0 : index
    %c0_11 = arith.constant 0 : index
    %c0_12 = arith.constant 0 : index
    %25 = vector.load %arg4[%c0_10, %c0_11, %c0_12] : memref<1x4x1xf32, #tpu.memory_space<vmem>>, vector<1x4x1xf32>
    %26 = vector.broadcast %25 : vector<1x4x1xf32> to vector<2x4x256xf32>
    %27 = arith.addf %24, %26 : vector<2x4x256xf32>
    %c0_13 = arith.constant 0 : index
    %c0_14 = arith.constant 0 : index
    %c0_15 = arith.constant 0 : index
    %28 = vector.load %arg5[%c0_13, %c0_14, %c0_15] : memref<2x4x256xf32, #tpu.memory_space<vmem>>, vector<2x4x256xf32>
    tpu.vector_store %arg5[%c0_13, %c0_14, %c0_15], %27 {strides = array<i32>} : memref<2x4x256xf32, #tpu.memory_space<vmem>>, vector<2x4x256xf32>,
    return
  }
  func.func @transform_0(%arg0: i32, %arg1: i32) -> (i32, i32, i32) {
    %c0_i32 = arith.constant 0 : i32
    %c0_i32_0 = arith.constant 0 : i32
    return %arg0, %c0_i32, %arg1 : i32, i32, i32
  }
  func.func @transform_1(%arg0: i32, %arg1: i32) -> (i32, i32, i32) {
    %c0_i32 = arith.constant 0 : i32
    %c0_i32_0 = arith.constant 0 : i32
    %c0_i32_1 = arith.constant 0 : i32
    %c0_i32_2 = arith.constant 0 : i32
    return %c0_i32, %c0_i32_0, %c0_i32_1 : i32, i32, i32
  }
  func.func @transform_2(%arg0: i32, %arg1: i32) -> (i32, i32, i32) {
    %c0_i32 = arith.constant 0 : i32
    %c0_i32_0 = arith.constant 0 : i32
    %c0_i32_1 = arith.constant 0 : i32
    %c0_i32_2 = arith.constant 0 : i32
    return %c0_i32, %c0_i32_0, %c0_i32_1 : i32, i32, i32
  }
  func.func @transform_3(%arg0: i32, %arg1: i32) -> (i32, i32, i32) {
    %c0_i32 = arith.constant 0 : i32
    %c0_i32_0 = arith.constant 0 : i32
    return %arg0, %c0_i32, %arg1 : i32, i32, i32
  }
}

</mosaic_0001>

<bundles_post_ra>
// kernel: tpu_custom_call.1
= control target key start
LH: loop header
LB: loop body
LE: loop exit
PB: predicated region body
PF: predicated region fallthrough
CT: control target
= control target key end

     0   :  { %8 = vsyncpa [#allocation3], 0  ;;  %s415_s0 = inlined_call_operand.hbm [shape: f32[2,4,256], index: 0, kind: input, shape index: {}]   ;;  %s416_s1 = inlined_call_operand.vmem [shape: f32[1,4,1], index: 1, kind: input, shape index: {}]   ;;  %s417_s2 = inlined_call_operand.vmem [shape: f32[1,4,1], index: 2, kind: input, shape index: {}]   ;;  %s418_s3 = inlined_call_operand.hbm [shape: f32[2,4,256], index: 3, kind: output, shape index: {}]  }
   0x1   :  { %9 = vsyncpa [#allocation4], 0  ;;  %s14_s14 = sshll.u32 %s415_s0, 4  ;;  %s348_s15 = smov [#allocation2]   ;;  %s15_s14 = int_to_ptr.hbm [resolvable:$true] %s14_s14 }
   0x2   :  { %s16_s16 = sshll.u32 %s348_s15, 4  ;;  %s349_s17 = smov 128   ;;  %s17_s16 = int_to_ptr.vmem [resolvable:$true] %s16_s16 }
   0x3   :  { %s350_s18 = smov 8  }
   0x4   :  { %22 = dma.hbm_to_vmem [thread:$0]  %s15_s14, 256, %s17_s16, [#allocation3], %s349_s17, %s349_s17, %s350_s18  }
   0x5   :  { %344 = dma.done.wait [#allocation3], 256  }
   0x6   :  { %345 = vsyncadd [#allocation3], 4294967040  ;;  %v351_v0 = vmov 0   ;;  %v352_v1 = vmov 4.0   ;;  %v225_v3 = vld [vmem:[%s416_s1] sm:$0xf] }
   0x7   :  { %277 = vset.pattern.permute.xlu0 %v351_v0  ;;  %278 = vrcp.f32 %v352_v1  ;;  %v31_v4 = vld [vmem:[#allocation2] sm:$0xff]  ;;  %v32_v5 = vld [vmem:[#allocation2 + $0x8] sm:$0xff]  ;;  %v237_v7 = vld [vmem:[%s417_s2] sm:$0xf]  ;;  %vm46_vm0 = vcmask 1043456   ;;  %s354_s1 = smov [#allocation5]  }
   0x8   :  { %228 = vperm.xlu0 %277, %v225_v3   ;;  %35 = vst [vmem:[#allocation1] ss:$2 sm:$0xff] %v31_v4  ;;  %s255_s2 = sshll.u32 %s354_s1, 4  ;;  %s257_s24 = sshll.u32 %s418_s3, 4  ;;  %s256_s2 = int_to_ptr.vmem [resolvable:$true] %s255_s2  ;;  %s258_s24 = int_to_ptr.hbm [resolvable:$true] %s257_s24 }
   0x9   :  { %39 = vst [vmem:[#allocation1 + $0x10] ss:$2 sm:$0xff] %v32_v5 }
   0xd   :  { %v279_v2 = vpop.eup %278 }
   0xe   :  { %v76_v6 = vmul.f32 4.0, %v279_v2  ;;  %vm80_vm1 = vweird.f32 %v279_v2 }
   0xf   :  { %v36_v9 = vld.sshfl [vmem:[#allocation1] sm:$0xff pattern:$0x75316420]  ;;  %v37_v10 = vld.sshfl [vmem:[#allocation1 + $0x8] sm:$0xff pattern:$0x75316420] }
  0x10   :  { %v77_v8 = vsub.f32 1.0, %v76_v6  ;;  %240 = vperm.xlu0 %277, %v237_v7   ;;  %v40_v11 = vld.sshfl [vmem:[#allocation1 + $0x10] sm:$0xff pattern:$0x75316420]  ;;  %v47_v13 = vsel %vm46_vm0, %v36_v9, 0.0  ;;  %v54_v14 = vsel %vm46_vm0, %v37_v10, 0.0 }
  0x11   :  { %v41_v12 = vld.sshfl [vmem:[#allocation1 + $0x18] sm:$0xff pattern:$0x75316420]  ;;  %v61_v15 = vsel %vm46_vm0, %v40_v11, 0.0  ;;  %v48_v17 = vrot.slane %v47_v13, 4  ;;  %v55_v18 = vrot.slane %v54_v14, 4 }
  0x12   :  { %v68_v16 = vsel %vm46_vm0, %v41_v12, 0.0  ;;  %v62_v19 = vrot.slane %v61_v15, 4  ;;  %v78_v21 = vmul.f32 %v279_v2, %v77_v8 }
  0x13   :  { %v69_v20 = vrot.slane %v68_v16, 4  ;;  %v49_v22 = vadd.f32 %v48_v17, %v47_v13  ;;  %v56_v23 = vadd.f32 %v55_v18, %v54_v14 }
  0x14   :  { %v63_v24 = vadd.f32 %v62_v19, %v61_v15  ;;  %v79_v30 = vadd.f32 %v279_v2, %v78_v21 }
  0x15   :  { %v70_v25 = vadd.f32 %v69_v20, %v68_v16  ;;  %v50_v26 = vrot.slane %v49_v22, 2  ;;  %v57_v27 = vrot.slane %v56_v23, 2 }
  0x16   :  { %v64_v28 = vrot.slane %v63_v24, 2  ;;  %v81_v39 = vsel %vm80_vm1, %v279_v2, %v79_v30 }
  0x17   :  { %v71_v29 = vrot.slane %v70_v25, 2  ;;  %v51_v31 = vadd.f32 %v50_v26, %v49_v22  ;;  %v58_v32 = vadd.f32 %v57_v27, %v56_v23 }
  0x18   :  { %v65_v33 = vadd.f32 %v64_v28, %v63_v24 }
  0x19   :  { %v72_v34 = vadd.f32 %v71_v29, %v70_v25  ;;  %v52_v35 = vrot.slane %v51_v31, 1  ;;  %v59_v36 = vrot.slane %v58_v32, 1 }
  0x1a   :  { %v66_v37 = vrot.slane %v65_v33, 1 }
  0x1b   :  { %v73_v38 = vrot.slane %v72_v34, 1  ;;  %v53_v40 = vadd.f32 %v52_v35, %v51_v31  ;;  %v60_v41 = vadd.f32 %v59_v36, %v58_v32 }
  0x1c   :  { %v67_v42 = vadd.f32 %v66_v37, %v65_v33 }
  0x1d   :  { %v74_v43 = vadd.f32 %v73_v38, %v72_v34  ;;  %v82_v44 = vmul.f32 %v81_v39, %v53_v40  ;;  %v83_v45 = vmul.f32 %v81_v39, %v60_v41 }
  0x1e   :  { %v84_v46 = vmul.f32 %v81_v39, %v67_v42 }
  0x1f   :  { %v85_v47 = vmul.f32 %v81_v39, %v74_v43  ;;  %v90_v48 = vrot.slane %v83_v45, 4 }
  0x21   :  { %v91_v49 = vrot.slane %v85_v47, 4  ;;  %v92_v50 = vsel %vm46_vm0, %v82_v44, %v90_v48 }
  0x22   :  { %v393_v52 = vsub.f32 %v31_v4, %v92_v50 }
  0x23   :  { %v93_v51 = vsel %vm46_vm0, %v84_v46, %v91_v49 }
  0x24   :  { %v395_v53 = vsub.f32 %v32_v5, %v93_v51  ;;  %v98_v54 = vmul.f32 %v393_v52, %v393_v52 }
  0x26   :  { %v99_v55 = vmul.f32 %v395_v53, %v395_v53  ;;  %102 = vst [vmem:[#allocation1] ss:$2 sm:$0xff] %v98_v54 }
  0x28   :  { %106 = vst [vmem:[#allocation1 + $0x10] ss:$2 sm:$0xff] %v99_v55 }
  0x2d   :  { %v103_v56 = vld.sshfl [vmem:[#allocation1] sm:$0xff pattern:$0x75316420]  ;;  %v104_v57 = vld.sshfl [vmem:[#allocation1 + $0x8] sm:$0xff pattern:$0x75316420] }
  0x2e   :  { %v113_v60 = vsel %vm46_vm0, %v103_v56, 0.0  ;;  %v120_v61 = vsel %vm46_vm0, %v104_v57, 0.0 }
  0x2f   :  { %v107_v58 = vld.sshfl [vmem:[#allocation1 + $0x10] sm:$0xff pattern:$0x75316420]  ;;  %v108_v59 = vld.sshfl [vmem:[#allocation1 + $0x18] sm:$0xff pattern:$0x75316420] }
  0x30   :  { %v127_v62 = vsel %vm46_vm0, %v107_v58, 0.0  ;;  %v134_v63 = vsel %vm46_vm0, %v108_v59, 0.0  ;;  %v114_v0 = vrot.slane %v113_v60, 4  ;;  %v121_v1 = vrot.slane %v120_v61, 4 }
  0x31   :  { %v128_v2 = vrot.slane %v127_v62, 4  ;;  %v135_v3 = vrot.slane %v134_v63, 4 }
  0x32   :  { %v115_v4 = vadd.f32 %v114_v0, %v113_v60  ;;  %v122_v5 = vadd.f32 %v121_v1, %v120_v61 }
  0x33   :  { %v129_v6 = vadd.f32 %v128_v2, %v127_v62  ;;  %v136_v7 = vadd.f32 %v135_v3, %v134_v63 }
  0x34   :  { %v116_v8 = vrot.slane %v115_v4, 2  ;;  %v123_v9 = vrot.slane %v122_v5, 2 }
  0x35   :  { %v130_v10 = vrot.slane %v129_v6, 2  ;;  %v137_v11 = vrot.slane %v136_v7, 2 }
  0x36   :  { %v117_v12 = vadd.f32 %v116_v8, %v115_v4  ;;  %v124_v13 = vadd.f32 %v123_v9, %v122_v5 }
  0x37   :  { %v131_v14 = vadd.f32 %v130_v10, %v129_v6  ;;  %v138_v15 = vadd.f32 %v137_v11, %v136_v7 }
  0x38   :  { %v118_v16 = vrot.slane %v117_v12, 1  ;;  %v125_v17 = vrot.slane %v124_v13, 1 }
  0x39   :  { %v132_v18 = vrot.slane %v131_v14, 1  ;;  %v139_v19 = vrot.slane %v138_v15, 1 }
  0x3a   :  { %v119_v20 = vadd.f32 %v118_v16, %v117_v12  ;;  %v126_v21 = vadd.f32 %v125_v17, %v124_v13 }
  0x3b   :  { %v133_v22 = vadd.f32 %v132_v18, %v131_v14  ;;  %v140_v23 = vadd.f32 %v139_v19, %v138_v15 }
  0x3c   :  { %v141_v24 = vmul.f32 0.33333334, %v119_v20  ;;  %v142_v25 = vmul.f32 0.33333334, %v126_v21 }
  0x3d   :  { %v143_v26 = vmul.f32 0.33333334, %v133_v22  ;;  %v144_v27 = vmul.f32 0.33333334, %v140_v23 }
  0x3e   :  { %280 = vrsqrt.f32 %v141_v24  ;;  %vm164_vm2 = vcmp.eq.f32.partialorder %v142_v25, inf  ;;  %v167_v56 = vand.u32 2147483648, %v142_v25  ;;  %vm166_vm4 = vcmp.eq.f32.partialorder %v142_v25, 0.0 }
  0x3f   :  { %282 = vrsqrt.f32 %v142_v25  ;;  %vm188_vm3 = vcmp.eq.f32.partialorder %v144_v27, inf  ;;  %v191_v59 = vand.u32 2147483648, %v144_v27  ;;  %vm152_vm5 = vcmp.eq.f32.partialorder %v141_v24, inf }
  0x40   :  { %284 = vrsqrt.f32 %v143_v26  ;;  %vm190_vm6 = vcmp.eq.f32.partialorder %v144_v27, 0.0  ;;  %vm176_vm7 = vcmp.eq.f32.partialorder %v143_v26, inf  ;;  %v155_v62 = vand.u32 2147483648, %v141_v24 }
  0x41   :  { %286 = vrsqrt.f32 %v144_v27  ;;  %vm154_vm8 = vcmp.eq.f32.partialorder %v141_v24, 0.0  ;;  %v179_v1 = vand.u32 2147483648, %v143_v26  ;;  %vm178_vm9 = vcmp.eq.f32.partialorder %v143_v26, 0.0 }
  0x44   :  { %v281_v28 = vpop.eup %280 }
  0x45   :  { %v283_v29 = vpop.eup %282  ;;  %v146_v30 = vmul.f32 %v281_v28, %v141_v24 }
  0x46   :  { %v285_v31 = vpop.eup %284  ;;  %v158_v32 = vmul.f32 %v283_v29, %v142_v25 }
  0x47   :  { %v287_v33 = vpop.eup %286  ;;  %v147_v34 = vmul.f32 %v281_v28, %v146_v30  ;;  %v170_v35 = vmul.f32 %v285_v31, %v143_v26 }
  0x48   :  { %v159_v36 = vmul.f32 %v283_v29, %v158_v32  ;;  %v182_v38 = vmul.f32 %v287_v33, %v144_v27 }
  0x49   :  { %v171_v37 = vmul.f32 %v285_v31, %v170_v35  ;;  %v148_v40 = vmul.f32 0.5, %v147_v34 }
  0x4a   :  { %v160_v39 = vmul.f32 0.5, %v159_v36  ;;  %v183_v41 = vmul.f32 %v287_v33, %v182_v38 }
  0x4b   :  { %v172_v43 = vmul.f32 0.5, %v171_v37  ;;  %v149_v45 = vsub.f32 1.5, %v148_v40 }
  0x4c   :  { %v161_v42 = vsub.f32 1.5, %v160_v39  ;;  %v184_v44 = vmul.f32 0.5, %v183_v41 }
  0x4d   :  { %v173_v48 = vsub.f32 1.5, %v172_v43  ;;  %v150_v50 = vmul.f32 %v281_v28, %v149_v45 }
  0x4e   :  { %v162_v46 = vmul.f32 %v283_v29, %v161_v42  ;;  %v185_v47 = vsub.f32 1.5, %v184_v44 }
  0x4f   :  { %v174_v54 = vmul.f32 %v285_v31, %v173_v48  ;;  %v151_v57 = vmul.f32 %v150_v50, %v141_v24 }
  0x50   :  { %v186_v49 = vmul.f32 %v287_v33, %v185_v47  ;;  %v163_v51 = vmul.f32 %v162_v46, %v142_v25 }
  0x51   :  { %v175_v60 = vmul.f32 %v174_v54, %v143_v26  ;;  %v153_v0 = vsel %vm152_vm5, %v141_v24, %v151_v57  ;;  %v353_v24 = vmov 839922192  }
  0x52   :  { %v187_v55 = vmul.f32 %v186_v49, %v144_v27  ;;  %v165_v58 = vsel %vm164_vm2, %v142_v25, %v163_v51  ;;  %v156_v5 = vsel %vm154_vm8, %v155_v62, %v153_v0  ;;  %v231_v25 = vunpack.c.l.s4 %v353_v24 }
  0x53   :  { %v168_v63 = vsel %vm166_vm4, %v167_v56, %v165_v58  ;;  %v177_v3 = vsel %vm176_vm7, %v143_v26, %v175_v60  ;;  %v193_v8 = vadd.f32 1e-05, %v156_v5 }
  0x54   :  { %v189_v61 = vsel %vm188_vm3, %v144_v27, %v187_v55  ;;  %v194_v4 = vadd.f32 1e-05, %v168_v63  ;;  %v180_v7 = vsel %vm178_vm9, %v179_v1, %v177_v3  ;;  %v232_v31 = vunpack.c.0.s8 %v231_v25 }
  0x55   :  { %v192_v2 = vsel %vm190_vm6, %v191_v59, %v189_v61  ;;  %v195_v9 = vadd.f32 1e-05, %v180_v7 }
  0x56   :  { %v196_v6 = vadd.f32 1e-05, %v192_v2  ;;  %288 = vrcp.f32 %v194_v4 }
  0x58   :  { %290 = vrcp.f32 %v196_v6 }
  0x59   :  { %292 = vrcp.f32 %v193_v8 }
  0x5a   :  { %294 = vrcp.f32 %v195_v9 }
  0x5c   :  { %v289_v10 = vpop.eup %288 }
  0x5d   :  { %v202_v13 = vmul.f32 %v289_v10, %v194_v4 }
  0x5e   :  { %v291_v11 = vpop.eup %290 }
  0x5f   :  { %v293_v12 = vpop.eup %292  ;;  %v204_v14 = vmul.f32 %v291_v11, %v196_v6  ;;  %v206_v18 = vsub.f32 2.0, %v202_v13 }
  0x60   :  { %v295_v15 = vpop.eup %294  ;;  %v201_v16 = vmul.f32 %v293_v12, %v193_v8 }
  0x61   :  { %v203_v17 = vmul.f32 %v295_v15, %v195_v9  ;;  %v208_v19 = vsub.f32 2.0, %v204_v14  ;;  %v210_v22 = vmul.f32 %v289_v10, %v206_v18 }
  0x62   :  { %v205_v20 = vsub.f32 2.0, %v201_v16 }
  0x63   :  { %v207_v21 = vsub.f32 2.0, %v203_v17  ;;  %v212_v23 = vmul.f32 %v291_v11, %v208_v19  ;;  %v217_v28 = vrot.slane %v210_v22, 4 }
  0x64   :  { %v209_v26 = vmul.f32 %v293_v12, %v205_v20 }
  0x65   :  { %v211_v27 = vmul.f32 %v295_v15, %v207_v21  ;;  %v218_v29 = vrot.slane %v212_v23, 4 }
  0x66   :  { %v219_v32 = vsel %vm46_vm0, %v209_v26, %v217_v28 }
  0x67   :  { %v220_v33 = vsel %vm46_vm0, %v211_v27, %v218_v29  ;;  %v223_v34 = vmul.f32 %v219_v32, %v393_v52 }
  0x68   :  { %v224_v35 = vmul.f32 %v220_v33, %v395_v53 }
  0x7a   :  { %v229_v30 = vpop.permute.xlu0 %228 }
  0x7b   :  { %v233_v36 = vperm.slane %v229_v30, %v232_v31 }
  0x7d   :  { %v235_v38 = vmul.f32 %v233_v36, %v223_v34  ;;  %v236_v39 = vmul.f32 %v233_v36, %v224_v35 }
  0x82   :  { %v241_v37 = vpop.permute.xlu0 %240 }
  0x83   :  { %v245_v40 = vperm.slane %v241_v37, %v232_v31 }
  0x85   :  { %v247_v41 = vadd.f32 %v245_v40, %v235_v38  ;;  %v248_v42 = vadd.f32 %v245_v40, %v236_v39 }
  0x87   :  { %249 = vst [vmem:[#allocation5] sm:$0xff] %v247_v41 }
  0x88   :  { %250 = vst [vmem:[#allocation5 + $0x8] sm:$0xff] %v248_v42 }
  0x89   :  { %263 = dma.vmem_to_hbm [thread:$0]  %s256_s2, 256, %s258_s24, [#allocation4], %s349_s17, %s349_s17, %s350_s18  }
  0x8a   :  { %346 = dma.done.wait [#allocation4], 256  }
  0x8b   :  { %347 = vsyncadd [#allocation4], 4294967040 }
  0x8c   :  { %268 = vsyncpa [#allocation3], 1 }
  0x8d   :  { %269 = vsyncpa [#allocation4], 1 }

</bundles_post_ra>
